<compile_context>
chip_gen: v5e
topology: v5e:2x2
jax: 0.10.0
libtpu: 0.0.40
codegen_flags: <defaults>
</compile_context>

<pallas_src>
from collections import OrderedDict

import jax
import jax.numpy as jnp
from jax import lax
from jax.experimental import pallas as pl
from jax.experimental.pallas import tpu as pltpu


# ------------------------------ Pallas kernel -------------------------------

def _fused_forward_kernel(p_ref, wT_ref, b_ref, fcw_ref, fcb_ref, out_ref):
    """One grid step = one block of NB images.

    p_ref  : [NB, K, HW]      im2col patches (K = KH*KW*Cin, HW lane-dense)
    wT_ref : [Cout, K]        conv weight with eval-BN scale folded in
    b_ref  : [Cout, 1]        conv bias + BN shift folded
    fcw_ref: [Cout, OUT, HW]  fc weight regrouped; HW (lane-dense) is contracted
    fcb_ref: [1, OUT]
    out_ref: [NB, OUT]
    """
    nb = p_ref.shape[0]
    cout = wT_ref.shape[0]
    hw = p_ref.shape[2]

    w = wT_ref[...]                                            # [Cout, K]
    bias = jnp.broadcast_to(b_ref[...], (cout, hw))            # hoisted broadcast

    # Conv-as-matmul (+ folded BatchNorm/bias) + ReLU, per image.  The NB dots
    # are independent; the activations (NB x [Cout, HW] f32, a few vregs) stay
    # in registers -- no VMEM scratch round trip.
    hs = [
        jnp.maximum(jnp.dot(w, p_ref[n], preferred_element_type=jnp.float32) + bias, 0.0)
        for n in range(nb)
    ]

    # Linear layer: out[n, o] = sum_c sum_h hs[n][c, h] * fcw[c, o, h] + fcb[o].
    # One independent MXU dot per channel with M = NB (no serial M=1 chain);
    # HW is the contracted minor (lane-dense) dim of both operands.
    partials = []
    for c in range(cout):
        lhs_c = jnp.concatenate([h[c:c + 1, :] for h in hs], axis=0)      # [NB, HW]
        partials.append(
            lax.dot_general(
                lhs_c, fcw_ref[c],                                        # [OUT, HW]
                dimension_numbers=(((1,), (1,)), ((), ())),
                preferred_element_type=jnp.float32))                      # [NB, OUT]

    # Tree-sum the independent partial products, add the fc bias, and write the
    # whole batch block back in a single store.
    while len(partials) > 1:
        nxt = [partials[i] + partials[i + 1] for i in range(0, len(partials) - 1, 2)]
        if len(partials) % 2:
            nxt.append(partials[-1])
        partials = nxt
    out_ref[...] = partials[0] + fcb_ref[...]


def fused_forward_pallas(patches, conv_wt, conv_bcol, fcw_coh, fcb_row, *, block_n=None):
    N, K, HW = patches.shape
    Cout = conv_wt.shape[0]
    OUT = fcw_coh.shape[1]
    if block_n is None:
        block_n = N if N <= 8 else 8          # whole batch per step at small N
    assert N % block_n == 0, (N, block_n)

    single = pl.Buffered(1)                   # constant-index operands: 1 buffer
    out = pl.pallas_call(
        _fused_forward_kernel,
        out_shape=jax.ShapeDtypeStruct((N, OUT), jnp.float32),
        grid_spec=pltpu.PrefetchScalarGridSpec(
            num_scalar_prefetch=0,
            grid=(N // block_n,),
            in_specs=[
                pl.BlockSpec((block_n, K, HW), lambda i: (i, 0, 0)),
                pl.BlockSpec((Cout, K), lambda i: (0, 0), pipeline_mode=single),
                pl.BlockSpec((Cout, 1), lambda i: (0, 0), pipeline_mode=single),
                pl.BlockSpec((Cout, OUT, HW), lambda i: (0, 0, 0), pipeline_mode=single),
                pl.BlockSpec((1, OUT), lambda i: (0, 0), pipeline_mode=single),
            ],
            out_specs=pl.BlockSpec((block_n, OUT), lambda i: (i, 0)),
        ),
        compiler_params=pltpu.CompilerParams(dimension_semantics=("parallel",)),
    )(patches, conv_wt, conv_bcol, fcw_coh, fcb_row)
    return out


# ------------------------------- glue (JAX) ---------------------------------

def _im2col_nchw_t(x_nchw, kh, kw, pad):
    """[N,C,H,W] -> [N, kh*kw*C, H*W] patches (stride 1, symmetric padding).

    K-axis ordering is (kh, kw, c) to match conv_w.transpose(2,3,1,0); the H*W
    axis is (h, w) row-major, matching PyTorch's NCHW flatten feeding Linear.
    """
    N, C, H, W = x_nchw.shape
    xp = jnp.pad(x_nchw, ((0, 0), (0, 0), (pad, pad), (pad, pad)))
    taps = []
    for dy in range(kh):
        for dx in range(kw):
            taps.append(xp[:, :, dy:dy + H, dx:dx + W].reshape(N, C, H * W))
    return jnp.stack(taps, axis=1).reshape(N, kh * kw * C, H * W)


def meta_monkey_forward(x, parameters, buffers, eps=1e-5, block_n=None):
    """Equivalent of MetaMonkey.forward(inputs, parameters) for the net above.

    `parameters` is an OrderedDict in net.named_parameters() order:
      conv.weight, conv.bias, bn.weight, bn.bias, fc.weight, fc.bias
    `buffers` holds BatchNorm running stats (eval mode / track_running_stats).
    """
    p = iter(parameters.values())
    conv_w, conv_b = next(p), next(p)          # [O,I,KH,KW], [O]
    bn_g, bn_b = next(p), next(p)              # [O], [O]
    fc_w, fc_b = next(p), next(p)              # [OUT,IN], [OUT]
    rm = buffers["bn.running_mean"]
    rv = buffers["bn.running_var"]

    N, C, H, W = x.shape
    Cout, _, KH, KW = conv_w.shape
    OUT = fc_w.shape[0]
    HW = H * W
    K = KH * KW * C

    # ---- one-time host-side prep (weights only; pure layout plumbing) ----
    # Eval-mode BatchNorm folded into the conv weight/bias.
    scale = bn_g / jnp.sqrt(rv + eps)                               # [Cout]
    shift = bn_b - rm * scale
    w_mat = jnp.transpose(conv_w, (2, 3, 1, 0)).reshape(K, Cout)    # [K, Cout]
    conv_wt = (w_mat * scale[None, :]).T                            # [Cout, K]
    conv_bcol = (conv_b * scale + shift).reshape(Cout, 1)           # [Cout, 1]
    # fc weight regrouped to [Cout, OUT, HW]: lane-dense last dim (HW), and the
    # kernel contracts the conv's native [*, HW] layout per channel -- no
    # activation transpose anywhere, no 4x lane padding of the fc weight.
    fcw_coh = fc_w.reshape(OUT, Cout, HW).transpose(1, 0, 2)        # [Cout, OUT, HW]
    fcb_row = fc_b.reshape(1, OUT)

    # Conv expressed as im2col matmul (stride 1, padding 1, dilation 1, groups 1).
    # TODO(synk): the 9x im2col expansion is materialized in HBM; negligible at
    # this size (<100 KiB) but should be built in-kernel (static lane rolls +
    # edge masks) if N/H/W grow.
    patches = _im2col_nchw_t(x, KH, KW, pad=1)                      # [N, K, HW]

    # TODO(synk): for large, compute-bound problems on v6e/v7x, cast patches and
    # conv/fc weights to bf16 (f32 accumulate) -- not done here; it would break
    # the 1e-4 tolerance and the kernel is overhead-bound at these shapes.
    return fused_forward_pallas(patches, conv_wt, conv_bcol, fcw_coh, fcb_row,
                                block_n=block_n)


# ----------------------------- reference (JAX) ------------------------------

def reference_forward(x, parameters, buffers, eps=1e-5):
    conv_w = parameters["conv.weight"]
    conv_b = parameters["conv.bias"]
    bn_g = parameters["bn.weight"]
    bn_b = parameters["bn.bias"]
    fc_w = parameters["fc.weight"]
    fc_b = parameters["fc.bias"]
    rm, rv = buffers["bn.running_mean"], buffers["bn.running_var"]

    y = jax.lax.conv_general_dilated(
        x, conv_w, window_strides=(1, 1), padding=((1, 1), (1, 1)),
        dimension_numbers=("NCHW", "OIHW", "NCHW"),
    ) + conv_b[None, :, None, None]
    y = (y - rm[None, :, None, None]) / jnp.sqrt(rv + eps)[None, :, None, None]
    y = y * bn_g[None, :, None, None] + bn_b[None, :, None, None]
    y = jnp.maximum(y, 0.0)
    y = y.reshape(x.shape[0], -1)
    return y @ fc_w.T + fc_b


# --------------------------------- main -------------------------------------

if __name__ == "__main__":
    key = jax.random.PRNGKey(0)
    k_x, k_cw, k_cb, k_g, k_b, k_fw, k_fb = jax.random.split(key, 7)

    N, Cin, H, W = 2, 4, 16, 16
    Cout, KH, KW = 8, 3, 3
    OUT = 32

    x = jax.random.normal(k_x, (N, Cin, H, W), dtype=jnp.float32)

    # Deterministic "external" parameters (as MetaMonkey would receive them),
    # in net.named_parameters() order.
    parameters = OrderedDict(
        [
            ("conv.weight", 0.1 * jax.random.normal(k_cw, (Cout, Cin, KH, KW), jnp.float32)),
            ("conv.bias", 0.1 * jax.random.normal(k_cb, (Cout,), jnp.float32)),
            ("bn.weight", 1.0 + 0.05 * jax.random.normal(k_g, (Cout,), jnp.float32)),
            ("bn.bias", 0.05 * jax.random.normal(k_b, (Cout,), jnp.float32)),
            ("fc.weight", 0.02 * jax.random.normal(k_fw, (OUT, Cout * H * W), jnp.float32)),
            ("fc.bias", 0.02 * jax.random.normal(k_fb, (OUT,), jnp.float32)),
        ]
    )
    # BatchNorm buffers (not parameters; MetaMonkey reads them off the module).
    buffers = {
        "bn.running_mean": jnp.zeros((Cout,), jnp.float32),
        "bn.running_var": jnp.ones((Cout,), jnp.float32),
    }
    # TODO(synk): training-mode BatchNorm (batch-statistics path of F.batch_norm)
    # is not exercised; eval-mode running-stats path is implemented.

    out = meta_monkey_forward(x, parameters, buffers)
    out = jax.block_until_ready(out)

    ref = jax.block_until_ready(reference_forward(x, parameters, buffers))

    assert out.shape == (N, OUT), out.shape
    assert jnp.allclose(out, ref, atol=1e-4, rtol=1e-4), (
        float(jnp.max(jnp.abs(out - ref)))
    )
    print("KERNEL_OK")
</pallas_src>

<mosaic_0001>
module attributes {stable_mosaic.version = 11 : i64} {
  func.func @_fused_forward_kernel(%arg0: i32, %arg1: memref<2x36x256xf32, #tpu.memory_space<vmem>>, %arg2: memref<8x36xf32, #tpu.memory_space<vmem>>, %arg3: memref<8x1xf32, #tpu.memory_space<vmem>>, %arg4: memref<8x32x256xf32, #tpu.memory_space<vmem>>, %arg5: memref<1x32xf32, #tpu.memory_space<vmem>>, %arg6: memref<2x32xf32, #tpu.memory_space<vmem>>) attributes {dimension_semantics = [#tpu.dimension_semantics<parallel>], iteration_bounds = array<i64: 1>, scalar_prefetch = 0 : i64, scratch_operands = 0 : i64, tpu.core_type = #tpu.core_type<tc>, window_params = [{transform_indices = @transform_0, window_bounds = array<i64: 2, 36, 256>}, {pipeline_mode = #tpu.pipeline_mode<synchronous>, transform_indices = @transform_1, window_bounds = array<i64: 8, 36>}, {pipeline_mode = #tpu.pipeline_mode<synchronous>, transform_indices = @transform_2, window_bounds = array<i64: 8, 1>}, {pipeline_mode = #tpu.pipeline_mode<synchronous>, transform_indices = @transform_3, window_bounds = array<i64: 8, 32, 256>}, {pipeline_mode = #tpu.pipeline_mode<synchronous>, transform_indices = @transform_4, window_bounds = array<i64: 1, 32>}, {transform_indices = @transform_5, window_bounds = array<i64: 2, 32>}]} {
    %c0 = arith.constant 0 : index
    %c0_0 = arith.constant 0 : index
    %0 = vector.load %arg2[%c0, %c0_0] : memref<8x36xf32, #tpu.memory_space<vmem>>, vector<8x36xf32>
    %c0_1 = arith.constant 0 : index
    %c0_2 = arith.constant 0 : index
    %1 = vector.load %arg3[%c0_1, %c0_2] : memref<8x1xf32, #tpu.memory_space<vmem>>, vector<8x1xf32>
    %2 = vector.shape_cast %1 : vector<8x1xf32> to vector<8x1xf32>
    %3 = vector.broadcast %2 : vector<8x1xf32> to vector<8x256xf32>
    %c0_3 = arith.constant 0 : index
    %c0_4 = arith.constant 0 : index
    %c0_5 = arith.constant 0 : index
    %4 = vector.load %arg1[%c0_3, %c0_4, %c0_5] : memref<2x36x256xf32, #tpu.memory_space<vmem>>, vector<1x36x256xf32>
    %5 = vector.shape_cast %4 : vector<1x36x256xf32> to vector<36x256xf32>
    %cst = arith.constant dense<0.000000e+00> : vector<8x256xf32>
    %6 = tpu.matmul %0, %5, %cst {dimension_numbers = #tpu.dot_dimension_numbers<[1], [0], [0], [1], [0, 0, 1, 1], [], []>} : vector<8x36xf32>, vector<36x256xf32>, vector<8x256xf32> -> vector<8x256xf32>
    %7 = arith.addf %6, %3 : vector<8x256xf32>
    %cst_6 = arith.constant 0.000000e+00 : f32
    %8 = vector.broadcast %cst_6 : f32 to vector<8x256xf32>
    %9 = arith.maximumf %7, %8 : vector<8x256xf32>
    %c1 = arith.constant 1 : index
    %c0_7 = arith.constant 0 : index
    %c0_8 = arith.constant 0 : index
    %10 = vector.load %arg1[%c1, %c0_7, %c0_8] : memref<2x36x256xf32, #tpu.memory_space<vmem>>, vector<1x36x256xf32>
    %11 = vector.shape_cast %10 : vector<1x36x256xf32> to vector<36x256xf32>
    %cst_9 = arith.constant dense<0.000000e+00> : vector<8x256xf32>
    %12 = tpu.matmul %0, %11, %cst_9 {dimension_numbers = #tpu.dot_dimension_numbers<[1], [0], [0], [1], [0, 0, 1, 1], [], []>} : vector<8x36xf32>, vector<36x256xf32>, vector<8x256xf32> -> vector<8x256xf32>
    %13 = arith.addf %12, %3 : vector<8x256xf32>
    %cst_10 = arith.constant 0.000000e+00 : f32
    %14 = vector.broadcast %cst_10 : f32 to vector<8x256xf32>
    %15 = arith.maximumf %13, %14 : vector<8x256xf32>
    %16 = vector.extract_strided_slice %9 {offsets = [0, 0], sizes = [1, 256], strides = [1, 1]} : vector<8x256xf32> to vector<1x256xf32>
    %17 = vector.extract_strided_slice %15 {offsets = [0, 0], sizes = [1, 256], strides = [1, 1]} : vector<8x256xf32> to vector<1x256xf32>
    %18 = tpu.concatenate %16, %17 in 0 : vector<1x256xf32>, vector<1x256xf32> -> vector<2x256xf32>
    %c0_11 = arith.constant 0 : index
    %c0_12 = arith.constant 0 : index
    %c0_13 = arith.constant 0 : index
    %19 = vector.load %arg4[%c0_11, %c0_12, %c0_13] : memref<8x32x256xf32, #tpu.memory_space<vmem>>, vector<1x32x256xf32>
    %20 = vector.shape_cast %19 : vector<1x32x256xf32> to vector<32x256xf32>
    %cst_14 = arith.constant dense<0.000000e+00> : vector<2x32xf32>
    %21 = tpu.matmul %18, %20, %cst_14 {dimension_numbers = #tpu.dot_dimension_numbers<[1], [1], [0], [0], [0, 0, 1, 0], [], []>} : vector<2x256xf32>, vector<32x256xf32>, vector<2x32xf32> -> vector<2x32xf32>
    %22 = vector.extract_strided_slice %9 {offsets = [1, 0], sizes = [1, 256], strides = [1, 1]} : vector<8x256xf32> to vector<1x256xf32>
    %23 = vector.extract_strided_slice %15 {offsets = [1, 0], sizes = [1, 256], strides = [1, 1]} : vector<8x256xf32> to vector<1x256xf32>
    %24 = tpu.concatenate %22, %23 in 0 : vector<1x256xf32>, vector<1x256xf32> -> vector<2x256xf32>
    %c1_15 = arith.constant 1 : index
    %c0_16 = arith.constant 0 : index
    %c0_17 = arith.constant 0 : index
    %25 = vector.load %arg4[%c1_15, %c0_16, %c0_17] : memref<8x32x256xf32, #tpu.memory_space<vmem>>, vector<1x32x256xf32>
    %26 = vector.shape_cast %25 : vector<1x32x256xf32> to vector<32x256xf32>
    %cst_18 = arith.constant dense<0.000000e+00> : vector<2x32xf32>
    %27 = tpu.matmul %24, %26, %cst_18 {dimension_numbers = #tpu.dot_dimension_numbers<[1], [1], [0], [0], [0, 0, 1, 0], [], []>} : vector<2x256xf32>, vector<32x256xf32>, vector<2x32xf32> -> vector<2x32xf32>
    %28 = vector.extract_strided_slice %9 {offsets = [2, 0], sizes = [1, 256], strides = [1, 1]} : vector<8x256xf32> to vector<1x256xf32>
    %29 = vector.extract_strided_slice %15 {offsets = [2, 0], sizes = [1, 256], strides = [1, 1]} : vector<8x256xf32> to vector<1x256xf32>
    %30 = tpu.concatenate %28, %29 in 0 : vector<1x256xf32>, vector<1x256xf32> -> vector<2x256xf32>
    %c2 = arith.constant 2 : index
    %c0_19 = arith.constant 0 : index
    %c0_20 = arith.constant 0 : index
    %31 = vector.load %arg4[%c2, %c0_19, %c0_20] : memref<8x32x256xf32, #tpu.memory_space<vmem>>, vector<1x32x256xf32>
    %32 = vector.shape_cast %31 : vector<1x32x256xf32> to vector<32x256xf32>
    %cst_21 = arith.constant dense<0.000000e+00> : vector<2x32xf32>
    %33 = tpu.matmul %30, %32, %cst_21 {dimension_numbers = #tpu.dot_dimension_numbers<[1], [1], [0], [0], [0, 0, 1, 0], [], []>} : vector<2x256xf32>, vector<32x256xf32>, vector<2x32xf32> -> vector<2x32xf32>
    %34 = vector.extract_strided_slice %9 {offsets = [3, 0], sizes = [1, 256], strides = [1, 1]} : vector<8x256xf32> to vector<1x256xf32>
    %35 = vector.extract_strided_slice %15 {offsets = [3, 0], sizes = [1, 256], strides = [1, 1]} : vector<8x256xf32> to vector<1x256xf32>
    %36 = tpu.concatenate %34, %35 in 0 : vector<1x256xf32>, vector<1x256xf32> -> vector<2x256xf32>
    %c3 = arith.constant 3 : index
    %c0_22 = arith.constant 0 : index
    %c0_23 = arith.constant 0 : index
    %37 = vector.load %arg4[%c3, %c0_22, %c0_23] : memref<8x32x256xf32, #tpu.memory_space<vmem>>, vector<1x32x256xf32>
    %38 = vector.shape_cast %37 : vector<1x32x256xf32> to vector<32x256xf32>
    %cst_24 = arith.constant dense<0.000000e+00> : vector<2x32xf32>
    %39 = tpu.matmul %36, %38, %cst_24 {dimension_numbers = #tpu.dot_dimension_numbers<[1], [1], [0], [0], [0, 0, 1, 0], [], []>} : vector<2x256xf32>, vector<32x256xf32>, vector<2x32xf32> -> vector<2x32xf32>
    %40 = vector.extract_strided_slice %9 {offsets = [4, 0], sizes = [1, 256], strides = [1, 1]} : vector<8x256xf32> to vector<1x256xf32>
    %41 = vector.extract_strided_slice %15 {offsets = [4, 0], sizes = [1, 256], strides = [1, 1]} : vector<8x256xf32> to vector<1x256xf32>
    %42 = tpu.concatenate %40, %41 in 0 : vector<1x256xf32>, vector<1x256xf32> -> vector<2x256xf32>
    %c4 = arith.constant 4 : index
    %c0_25 = arith.constant 0 : index
    %c0_26 = arith.constant 0 : index
    %43 = vector.load %arg4[%c4, %c0_25, %c0_26] : memref<8x32x256xf32, #tpu.memory_space<vmem>>, vector<1x32x256xf32>
    %44 = vector.shape_cast %43 : vector<1x32x256xf32> to vector<32x256xf32>
    %cst_27 = arith.constant dense<0.000000e+00> : vector<2x32xf32>
    %45 = tpu.matmul %42, %44, %cst_27 {dimension_numbers = #tpu.dot_dimension_numbers<[1], [1], [0], [0], [0, 0, 1, 0], [], []>} : vector<2x256xf32>, vector<32x256xf32>, vector<2x32xf32> -> vector<2x32xf32>
    %46 = vector.extract_strided_slice %9 {offsets = [5, 0], sizes = [1, 256], strides = [1, 1]} : vector<8x256xf32> to vector<1x256xf32>
    %47 = vector.extract_strided_slice %15 {offsets = [5, 0], sizes = [1, 256], strides = [1, 1]} : vector<8x256xf32> to vector<1x256xf32>
    %48 = tpu.concatenate %46, %47 in 0 : vector<1x256xf32>, vector<1x256xf32> -> vector<2x256xf32>
    %c5 = arith.constant 5 : index
    %c0_28 = arith.constant 0 : index
    %c0_29 = arith.constant 0 : index
    %49 = vector.load %arg4[%c5, %c0_28, %c0_29] : memref<8x32x256xf32, #tpu.memory_space<vmem>>, vector<1x32x256xf32>
    %50 = vector.shape_cast %49 : vector<1x32x256xf32> to vector<32x256xf32>
    %cst_30 = arith.constant dense<0.000000e+00> : vector<2x32xf32>
    %51 = tpu.matmul %48, %50, %cst_30 {dimension_numbers = #tpu.dot_dimension_numbers<[1], [1], [0], [0], [0, 0, 1, 0], [], []>} : vector<2x256xf32>, vector<32x256xf32>, vector<2x32xf32> -> vector<2x32xf32>
    %52 = vector.extract_strided_slice %9 {offsets = [6, 0], sizes = [1, 256], strides = [1, 1]} : vector<8x256xf32> to vector<1x256xf32>
    %53 = vector.extract_strided_slice %15 {offsets = [6, 0], sizes = [1, 256], strides = [1, 1]} : vector<8x256xf32> to vector<1x256xf32>
    %54 = tpu.concatenate %52, %53 in 0 : vector<1x256xf32>, vector<1x256xf32> -> vector<2x256xf32>
    %c6 = arith.constant 6 : index
    %c0_31 = arith.constant 0 : index
    %c0_32 = arith.constant 0 : index
    %55 = vector.load %arg4[%c6, %c0_31, %c0_32] : memref<8x32x256xf32, #tpu.memory_space<vmem>>, vector<1x32x256xf32>
    %56 = vector.shape_cast %55 : vector<1x32x256xf32> to vector<32x256xf32>
    %cst_33 = arith.constant dense<0.000000e+00> : vector<2x32xf32>
    %57 = tpu.matmul %54, %56, %cst_33 {dimension_numbers = #tpu.dot_dimension_numbers<[1], [1], [0], [0], [0, 0, 1, 0], [], []>} : vector<2x256xf32>, vector<32x256xf32>, vector<2x32xf32> -> vector<2x32xf32>
    %58 = vector.extract_strided_slice %9 {offsets = [7, 0], sizes = [1, 256], strides = [1, 1]} : vector<8x256xf32> to vector<1x256xf32>
    %59 = vector.extract_strided_slice %15 {offsets = [7, 0], sizes = [1, 256], strides = [1, 1]} : vector<8x256xf32> to vector<1x256xf32>
    %60 = tpu.concatenate %58, %59 in 0 : vector<1x256xf32>, vector<1x256xf32> -> vector<2x256xf32>
    %c7 = arith.constant 7 : index
    %c0_34 = arith.constant 0 : index
    %c0_35 = arith.constant 0 : index
    %61 = vector.load %arg4[%c7, %c0_34, %c0_35] : memref<8x32x256xf32, #tpu.memory_space<vmem>>, vector<1x32x256xf32>
    %62 = vector.shape_cast %61 : vector<1x32x256xf32> to vector<32x256xf32>
    %cst_36 = arith.constant dense<0.000000e+00> : vector<2x32xf32>
    %63 = tpu.matmul %60, %62, %cst_36 {dimension_numbers = #tpu.dot_dimension_numbers<[1], [1], [0], [0], [0, 0, 1, 0], [], []>} : vector<2x256xf32>, vector<32x256xf32>, vector<2x32xf32> -> vector<2x32xf32>
    %64 = arith.addf %21, %27 : vector<2x32xf32>
    %65 = arith.addf %33, %39 : vector<2x32xf32>
    %66 = arith.addf %45, %51 : vector<2x32xf32>
    %67 = arith.addf %57, %63 : vector<2x32xf32>
    %68 = arith.addf %64, %65 : vector<2x32xf32>
    %69 = arith.addf %66, %67 : vector<2x32xf32>
    %70 = arith.addf %68, %69 : vector<2x32xf32>
    %c0_37 = arith.constant 0 : index
    %c0_38 = arith.constant 0 : index
    %71 = vector.load %arg5[%c0_37, %c0_38] : memref<1x32xf32, #tpu.memory_space<vmem>>, vector<1x32xf32>
    %72 = vector.broadcast %71 : vector<1x32xf32> to vector<2x32xf32>
    %73 = arith.addf %70, %72 : vector<2x32xf32>
    %c0_39 = arith.constant 0 : index
    %c0_40 = arith.constant 0 : index
    %74 = vector.load %arg6[%c0_39, %c0_40] : memref<2x32xf32, #tpu.memory_space<vmem>>, vector<2x32xf32>
    tpu.vector_store %arg6[%c0_39, %c0_40], %73 {strides = array<i32>} : memref<2x32xf32, #tpu.memory_space<vmem>>, vector<2x32xf32>,
    return
  }
  func.func @transform_0(%arg0: i32) -> (i32, i32, i32) {
    %c0_i32 = arith.constant 0 : i32
    %c0_i32_0 = arith.constant 0 : i32
    %c0_i32_1 = arith.constant 0 : i32
    return %arg0, %c0_i32, %c0_i32_0 : i32, i32, i32
  }
  func.func @transform_1(%arg0: i32) -> (i32, i32) {
    %c0_i32 = arith.constant 0 : i32
    %c0_i32_0 = arith.constant 0 : i32
    %c0_i32_1 = arith.constant 0 : i32
    return %c0_i32, %c0_i32_0 : i32, i32
  }
  func.func @transform_2(%arg0: i32) -> (i32, i32) {
    %c0_i32 = arith.constant 0 : i32
    %c0_i32_0 = arith.constant 0 : i32
    %c0_i32_1 = arith.constant 0 : i32
    return %c0_i32, %c0_i32_0 : i32, i32
  }
  func.func @transform_3(%arg0: i32) -> (i32, i32, i32) {
    %c0_i32 = arith.constant 0 : i32
    %c0_i32_0 = arith.constant 0 : i32
    %c0_i32_1 = arith.constant 0 : i32
    %c0_i32_2 = arith.constant 0 : i32
    return %c0_i32, %c0_i32_0, %c0_i32_1 : i32, i32, i32
  }
  func.func @transform_4(%arg0: i32) -> (i32, i32) {
    %c0_i32 = arith.constant 0 : i32
    %c0_i32_0 = arith.constant 0 : i32
    %c0_i32_1 = arith.constant 0 : i32
    return %c0_i32, %c0_i32_0 : i32, i32
  }
  func.func @transform_5(%arg0: i32) -> (i32, i32) {
    %c0_i32 = arith.constant 0 : i32
    %c0_i32_0 = arith.constant 0 : i32
    return %arg0, %c0_i32 : i32, i32
  }
}

</mosaic_0001>

<bundles_post_ra>
// kernel: tpu_custom_call.1
= control target key start
LH: loop header
LB: loop body
LE: loop exit
PB: predicated region body
PF: predicated region fallthrough
CT: control target
= control target key end

     0   :  { %10 = vsyncpa [#allocation3], 0  ;;  %s908_s0 = inlined_call_operand.vmem [shape: f32[2,36,256], index: 0, kind: input, shape index: {}]   ;;  %s909_s1 = inlined_call_operand.vmem [shape: f32[8,36], index: 1, kind: input, shape index: {}]   ;;  %s910_s2 = inlined_call_operand.vmem [shape: f32[8,1], index: 2, kind: input, shape index: {}]   ;;  %s911_s3 = inlined_call_operand.hbm [shape: f32[8,32,256], index: 3, kind: input, shape index: {}]   ;;  %s912_s4 = inlined_call_operand.vmem [shape: f32[1,32], index: 4, kind: input, shape index: {}]   ;;  %s913_s5 = inlined_call_operand.hbm [shape: f32[2,32], index: 5, kind: output, shape index: {}]  }
   0x1   :  { %11 = vsyncpa [#allocation4], 0  ;;  %s22_s20 = sshll.u32 %s911_s3, 4  ;;  %s738_s21 = smov [#allocation2]   ;;  %s23_s20 = int_to_ptr.hbm [resolvable:$true] %s22_s20 }
   0x2   :  { %s24_s22 = sshll.u32 %s738_s21, 4  ;;  %s739_s23 = smov 256   ;;  %s25_s22 = int_to_ptr.vmem [resolvable:$true] %s24_s22 }
   0x3   :  { %s740_s24 = smov 16  }
   0x4   :  { %30 = dma.hbm_to_vmem [thread:$0]  %s23_s20, 8192, %s25_s22, [#allocation3], %s739_s23, %s739_s23, %s740_s24  }
   0x5   :  { %734 = dma.done.wait [#allocation3], 8192  }
   0x6   :  { %735 = vsyncadd [#allocation3], 4294959104  ;;  %v741_v0 = vmov 0   ;;  %vm58_vm0 = vcmask 1043456   ;;  %v673_v1 = vld [vmem:[%s908_s0 + $0x90] sm:$0xf] }
   0x7   :  { %684 = vset.pattern.permute.xlu0 %v741_v0  ;;  %v674_v2 = vld [vmem:[%s908_s0 + $0x98] sm:$0xf]  ;;  %v671_v3 = vld [vmem:[%s908_s0 + $0x80] sm:$0xff]  ;;  %675 = vmatpush.msk.msra.mxu2 %vm58_vm0, %v673_v1  ;;  %v672_v4 = vld [vmem:[%s908_s0 + $0x88] sm:$0xff]  ;;  %vm54_vm1 = vcmask 293888   ;;  %vm172_vm2 = vcmask 1040384  }
   0x8   :  { %677 = vmatpush.msk.msra.mxu3 %vm58_vm0, %v674_v2  ;;  %v52_v5 = vld [vmem:[%s908_s0 + $0x40] sm:$0xf]  ;;  %v53_v6 = vld [vmem:[%s908_s0 + $0x48] sm:$0xf]  ;;  %v669_v7 = vld [vmem:[%s908_s0 + $0x70] sm:$0xff]  ;;  %s651_s20 = sshll.u32 %s913_s5, 4  ;;  %s652_s20 = int_to_ptr.hbm [resolvable:$true] %s651_s20 }
   0x9   :  { %661 = vmatpush.msk.msra.mxu0 %vm58_vm0, %v52_v5  ;;  %663 = vmatpush.msk.msra.mxu1 %vm58_vm0, %v53_v6  ;;  %v670_v8 = vld [vmem:[%s908_s0 + $0x78] sm:$0xff]  ;;  %v50_v9 = vld [vmem:[%s908_s0 + $0x30] sm:$0xff]  ;;  %v667_v11 = vld [vmem:[%s908_s0 + $0x60] sm:$0xff]  ;;  %vm642_vm3 = vcmask 254976  }
   0xa   :  { %136 = vmatpush.msra.mxu2 %v671_v3  ;;  %156 = vmatpush.msra.mxu3 %v672_v4  ;;  %v51_v10 = vld [vmem:[%s908_s0 + $0x38] sm:$0xff]  ;;  %v668_v12 = vld [vmem:[%s908_s0 + $0x68] sm:$0xff]  ;;  %v48_v13 = vld [vmem:[%s908_s0 + $0x20] sm:$0xff] }
   0xb   :  { %77 = vmatpush.msra.mxu0 %v50_v9  ;;  %97 = vmatpush.msra.mxu1 %v51_v10  ;;  %v49_v14 = vld [vmem:[%s908_s0 + $0x28] sm:$0xff]  ;;  %v46_v15 = vld [vmem:[%s908_s0 + $0x10] sm:$0xff]  ;;  %v666_v17 = vld [vmem:[%s908_s0 + $0x58] sm:$0xff] }
   0xc   :  { %137 = vmatpush.msra.mxu2 %v669_v7  ;;  %157 = vmatpush.msra.mxu3 %v670_v8  ;;  %v665_v16 = vld [vmem:[%s908_s0 + $0x50] sm:$0xff]  ;;  %v47_v18 = vld [vmem:[%s908_s0 + $0x18] sm:$0xff]  ;;  %v37_v19 = vld [vmem:[%s909_s1] sm:$0xff] }
   0xd   :  { %78 = vmatpush.msra.mxu0 %v48_v13  ;;  %98 = vmatpush.msra.mxu1 %v49_v14  ;;  %v44_v20 = vld [vmem:[%s908_s0] sm:$0xff]  ;;  %v45_v21 = vld [vmem:[%s908_s0 + $0x8] sm:$0xff]  ;;  %v198_v23 = vld [vmem:[#allocation2 + $0x70] sm:$0xff] }
   0xe   :  { %138 = vmatpush.msra.mxu2 %v667_v11  ;;  %158 = vmatpush.msra.mxu3 %v668_v12  ;;  %v38_v22 = vld [vmem:[%s910_s2] sm:$0xff]  ;;  %v199_v24 = vld [vmem:[#allocation2 + $0x78] sm:$0xff]  ;;  %v276_v25 = vld [vmem:[#allocation2 + $0xf0] sm:$0xff]  ;;  %s742_s2 = smov [#allocation5]  }
   0xf   :  { %79 = vmatpush.msra.mxu0 %v46_v15  ;;  %99 = vmatpush.msra.mxu1 %v47_v18  ;;  %v277_v26 = vld [vmem:[#allocation2 + $0xf8] sm:$0xff]  ;;  %v196_v27 = vld [vmem:[#allocation2 + $0x60] sm:$0xff]  ;;  %v197_v28 = vld [vmem:[#allocation2 + $0x68] sm:$0xff]  ;;  %s649_s17 = sshll.u32 %s742_s2, 4  ;;  %s650_s17 = int_to_ptr.vmem [resolvable:$true] %s649_s17 }
  0x10   :  { %139 = vmatpush.msra.mxu2 %v665_v16  ;;  %159 = vmatpush.msra.mxu3 %v666_v17  ;;  %v274_v29 = vld [vmem:[#allocation2 + $0xe0] sm:$0xff]  ;;  %v275_v30 = vld [vmem:[#allocation2 + $0xe8] sm:$0xff]  ;;  %v194_v31 = vld [vmem:[#allocation2 + $0x50] sm:$0xff] }
  0x11   :  { %676 = vmatmul.msk.f32.vlgmr.msra.gmra.mxu2 %vm54_vm1, %v37_v19  ;;  %678 = vmatmul.msk.f32.vlgmr.msra.gmra.mxu3 %vm54_vm1, %v37_v19  ;;  %v195_v32 = vld [vmem:[#allocation2 + $0x58] sm:$0xff]  ;;  %v272_v33 = vld [vmem:[#allocation2 + $0xd0] sm:$0xff]  ;;  %v192_v35 = vld [vmem:[#allocation2 + $0x40] sm:$0xff] }
  0x12   :  { %80 = vmatpush.msra.mxu0 %v44_v20  ;;  %100 = vmatpush.msra.mxu1 %v45_v21  ;;  %v273_v34 = vld [vmem:[#allocation2 + $0xd8] sm:$0xff]  ;;  %v193_v36 = vld [vmem:[#allocation2 + $0x48] sm:$0xff]  ;;  %v354_v37 = vld [vmem:[#allocation2 + $0x170] sm:$0xff] }
  0x13   :  { %662 = vmatmul.msk.f32.vlgmr.msra.gmra.mxu0 %vm54_vm1, %v37_v19  ;;  %664 = vmatmul.msk.f32.vlgmr.msra.gmra.mxu1 %vm54_vm1, %v37_v19  ;;  %v355_v38 = vld [vmem:[#allocation2 + $0x178] sm:$0xff]  ;;  %v270_v39 = vld [vmem:[#allocation2 + $0xc0] sm:$0xff]  ;;  %v271_v40 = vld [vmem:[#allocation2 + $0xc8] sm:$0xff] }
  0x14   :  { %41 = vperm.xlu0 %684, %v38_v22   ;;  %212 = vmatpush.xpose.msrb.mxu0 %v198_v23  ;;  %v432_v41 = vld [vmem:[#allocation2 + $0x1f0] sm:$0xff]  ;;  %v433_v42 = vld [vmem:[#allocation2 + $0x1f8] sm:$0xff]  ;;  %v352_v43 = vld [vmem:[#allocation2 + $0x160] sm:$0xff] }
  0x15   :  { %232 = vmatpush.xpose.msrb.mxu1 %v199_v24  ;;  %290 = vmatpush.xpose.msrb.mxu2 %v276_v25  ;;  %v353_v44 = vld [vmem:[#allocation2 + $0x168] sm:$0xff]  ;;  %v430_v45 = vld [vmem:[#allocation2 + $0x1e0] sm:$0xff]  ;;  %v350_v47 = vld [vmem:[#allocation2 + $0x150] sm:$0xff] }
  0x16   :  { %310 = vmatpush.xpose.msrb.mxu3 %v277_v26  ;;  %v431_v46 = vld [vmem:[#allocation2 + $0x1e8] sm:$0xff]  ;;  %v351_v48 = vld [vmem:[#allocation2 + $0x158] sm:$0xff]  ;;  %v428_v49 = vld [vmem:[#allocation2 + $0x1d0] sm:$0xff] }
  0x17   :  { %v429_v50 = vld [vmem:[#allocation2 + $0x1d8] sm:$0xff]  ;;  %v348_v51 = vld [vmem:[#allocation2 + $0x140] sm:$0xff]  ;;  %v349_v52 = vld [vmem:[#allocation2 + $0x148] sm:$0xff] }
  0x18   :  { %213 = vmatpush.xpose.msrb.mxu0 %v196_v27  ;;  %v426_v53 = vld [vmem:[#allocation2 + $0x1c0] sm:$0xff]  ;;  %v427_v54 = vld [vmem:[#allocation2 + $0x1c8] sm:$0xff]  ;;  %v181_v8 = vld [vmem:[#allocation2 + $0x30] sm:$0xff] }
  0x19   :  { %233 = vmatpush.xpose.msrb.mxu1 %v197_v28  ;;  %291 = vmatpush.xpose.msrb.mxu2 %v274_v29  ;;  %v182_v9 = vld [vmem:[#allocation2 + $0x38] sm:$0xff]  ;;  %v257_v14 = vld [vmem:[#allocation2 + $0xb0] sm:$0xff]  ;;  %v179_v18 = vld [vmem:[#allocation2 + $0x20] sm:$0xff] }
  0x1a   :  { %311 = vmatpush.xpose.msrb.mxu3 %v275_v30  ;;  %v258_v15 = vld [vmem:[#allocation2 + $0xb8] sm:$0xff]  ;;  %v180_v19 = vld [vmem:[#allocation2 + $0x28] sm:$0xff]  ;;  %v255_v24 = vld [vmem:[#allocation2 + $0xa0] sm:$0xff] }
  0x1b   :  { %v256_v25 = vld [vmem:[#allocation2 + $0xa8] sm:$0xff]  ;;  %v177_v30 = vld [vmem:[#allocation2 + $0x10] sm:$0xff] }
  0x1c   :  { %214 = vmatpush.xpose.msrb.mxu0 %v194_v31  ;;  %v178_v31 = vld [vmem:[#allocation2 + $0x18] sm:$0xff] }
  0x1d   :  { %234 = vmatpush.xpose.msrb.mxu1 %v195_v32  ;;  %292 = vmatpush.xpose.msrb.mxu2 %v272_v33 }
  0x1e   :  { %312 = vmatpush.xpose.msrb.mxu3 %v273_v34  ;;  %v253_v34 = vld [vmem:[#allocation2 + $0x90] sm:$0xff] }
  0x20   :  { %215 = vmatpush.xpose.msrb.mxu0 %v192_v35  ;;  %v254_v35 = vld [vmem:[#allocation2 + $0x98] sm:$0xff] }
  0x21   :  { %235 = vmatpush.xpose.msrb.mxu1 %v193_v36  ;;  %293 = vmatpush.xpose.msrb.mxu2 %v270_v39  ;;  %v176_v39 = vld [vmem:[#allocation2 + $0x8] sm:$0xff] }
  0x22   :  { %313 = vmatpush.xpose.msrb.mxu3 %v271_v40  ;;  %v335_v40 = vld [vmem:[#allocation2 + $0x130] sm:$0xff] }
  0x24   :  { %368 = vmatpush.xpose.msra.mxu0 %v354_v37 }
  0x25   :  { %388 = vmatpush.xpose.msra.mxu1 %v355_v38  ;;  %446 = vmatpush.xpose.msra.mxu2 %v432_v41  ;;  %v175_v38 = vld [vmem:[#allocation2] sm:$0xff]  ;;  %v336_v41 = vld [vmem:[#allocation2 + $0x138] sm:$0xff] }
  0x26   :  { %466 = vmatpush.xpose.msra.mxu3 %v433_v42  ;;  %v251_v42 = vld [vmem:[#allocation2 + $0x80] sm:$0xff] }
  0x28   :  { %369 = vmatpush.xpose.msra.mxu0 %v352_v43  ;;  %v252_v43 = vld [vmem:[#allocation2 + $0x88] sm:$0xff] }
  0x29   :  { %389 = vmatpush.xpose.msra.mxu1 %v353_v44  ;;  %447 = vmatpush.xpose.msra.mxu2 %v430_v45 }
  0x2a   :  { %467 = vmatpush.xpose.msra.mxu3 %v431_v46  ;;  %v413_v46 = vld [vmem:[#allocation2 + $0x1b0] sm:$0xff] }
  0x2c   :  { %370 = vmatpush.xpose.msra.mxu0 %v350_v47  ;;  %v414_v47 = vld [vmem:[#allocation2 + $0x1b8] sm:$0xff] }
  0x2d   :  { %390 = vmatpush.xpose.msra.mxu1 %v351_v48  ;;  %448 = vmatpush.xpose.msra.mxu2 %v428_v49 }
  0x2e   :  { %468 = vmatpush.xpose.msra.mxu3 %v429_v50 }
  0x30   :  { %371 = vmatpush.xpose.msra.mxu0 %v348_v51 }
  0x31   :  { %391 = vmatpush.xpose.msra.mxu1 %v349_v52  ;;  %449 = vmatpush.xpose.msra.mxu2 %v426_v53  ;;  %v333_v52 = vld [vmem:[#allocation2 + $0x120] sm:$0xff]  ;;  %v334_v53 = vld [vmem:[#allocation2 + $0x128] sm:$0xff] }
  0x32   :  { %469 = vmatpush.xpose.msra.mxu3 %v427_v54 }
  0x86   :  { %v42_v55 = vpop.permute.xlu0 %41 }
  0x90   :  { %v82_v56 = vpop.f32.mrf.mxu0  ;;  %v102_v57 = vpop.f32.mrf.mxu1 }
  0x91   :  { %v83_v58 = vadd.f32 %v82_v56, %v42_v55  ;;  %v103_v59 = vadd.f32 %v102_v57, %v42_v55  ;;  %v411_v56 = vld [vmem:[#allocation2 + $0x1a0] sm:$0xff]  ;;  %v412_v57 = vld [vmem:[#allocation2 + $0x1a8] sm:$0xff] }
  0x93   :  { %v846_v60 = vmax.f32 %v83_v58, 0.0  ;;  %v848_v61 = vmax.f32 %v103_v59, 0.0 }
  0x94   :  { %v141_v62 = vpop.f32.mrf.mxu2  ;;  %v161_v63 = vpop.f32.mrf.mxu3 }
  0x95   :  { %v142_v0 = vadd.f32 %v141_v62, %v42_v55  ;;  %v162_v1 = vadd.f32 %v161_v63, %v42_v55  ;;  %v185_v2 = vrot.slane %v846_v60, 1  ;;  %v186_v3 = vrot.slane %v848_v61, 1  ;;  %v331_v62 = vld [vmem:[#allocation2 + $0x110] sm:$0xff]  ;;  %v332_v63 = vld [vmem:[#allocation2 + $0x118] sm:$0xff] }
  0x96   :  { %v259_v6 = vrot.slane %v846_v60, 3  ;;  %v260_v7 = vrot.slane %v848_v61, 3  ;;  %v337_v20 = vrot.slane %v846_v60, 5  ;;  %v338_v22 = vrot.slane %v848_v61, 5 }
  0x97   :  { %v852_v4 = vmax.f32 %v142_v0, 0.0  ;;  %v854_v5 = vmax.f32 %v162_v1, 0.0  ;;  %v415_v26 = vrot.slane %v846_v60, 7  ;;  %v416_v28 = vrot.slane %v848_v61, 7  ;;  %v409_v0 = vld [vmem:[#allocation2 + $0x190] sm:$0xff]  ;;  %v410_v1 = vld [vmem:[#allocation2 + $0x198] sm:$0xff] }
  0x98   :  { %v240_v48 = vrot.slane %v846_v60, 2  ;;  %v241_v50 = vrot.slane %v848_v61, 2 }
  0x99   :  { %v189_v10 = vsel %vm172_vm2, %v185_v2, %v852_v4  ;;  %v190_v11 = vsel %vm172_vm2, %v186_v3, %v854_v5  ;;  %v263_v12 = vrot.slane %v852_v4, 2  ;;  %v264_v13 = vrot.slane %v854_v5, 2  ;;  %v329_v2 = vld [vmem:[#allocation2 + $0x100] sm:$0xff]  ;;  %v330_v3 = vld [vmem:[#allocation2 + $0x108] sm:$0xff] }
  0x9a   :  { %216 = vmatmul.f32.vlgmr.msrb.gmra.mxu0 %v189_v10  ;;  %236 = vmatmul.f32.vlgmr.msrb.gmra.mxu1 %v190_v11  ;;  %v341_v21 = vrot.slane %v852_v4, 4  ;;  %v342_v23 = vrot.slane %v854_v5, 4  ;;  %v419_v27 = vrot.slane %v852_v4, 6  ;;  %v420_v29 = vrot.slane %v854_v5, 6  ;;  %v407_v10 = vld [vmem:[#allocation2 + $0x180] sm:$0xff]  ;;  %v408_v11 = vld [vmem:[#allocation2 + $0x188] sm:$0xff] }
  0x9b   :  { %486 = vmatpush.xpose.msrb.mxu0 %v181_v8  ;;  %506 = vmatpush.xpose.msrb.mxu1 %v182_v9  ;;  %v267_v16 = vsel %vm172_vm2, %v259_v6, %v263_v12  ;;  %v268_v17 = vsel %vm172_vm2, %v260_v7, %v264_v13  ;;  %v168_v44 = vrot.slane %v852_v4, 7  ;;  %v169_v45 = vrot.slane %v854_v5, 7 }
  0x9c   :  { %294 = vmatmul.f32.vlgmr.msrb.gmra.mxu2 %v267_v16  ;;  %314 = vmatmul.f32.vlgmr.msrb.gmra.mxu3 %v268_v17  ;;  %v345_v32 = vsel %vm172_vm2, %v337_v20, %v341_v21  ;;  %v346_v33 = vsel %vm172_vm2, %v338_v22, %v342_v23  ;;  %v423_v36 = vsel %vm172_vm2, %v415_v26, %v419_v27  ;;  %v244_v49 = vrot.slane %v852_v4, 1 }
  0x9d   :  { %526 = vmatpush.xpose.msrb.mxu2 %v257_v14  ;;  %546 = vmatpush.xpose.msrb.mxu3 %v258_v15  ;;  %v424_v37 = vsel %vm172_vm2, %v416_v28, %v420_v29  ;;  %v245_v51 = vrot.slane %v854_v5, 1  ;;  %v173_v54 = vsel %vm172_vm2, %v846_v60, %v168_v44  ;;  %v174_v55 = vsel %vm172_vm2, %v848_v61, %v169_v45 }
  0x9e   :  { %v248_v58 = vsel %vm172_vm2, %v240_v48, %v244_v49  ;;  %v318_v6 = vrot.slane %v846_v60, 4  ;;  %v322_v7 = vrot.slane %v852_v4, 3  ;;  %v319_v8 = vrot.slane %v848_v61, 4 }
  0x9f   :  { %487 = vmatpush.xpose.msrb.mxu0 %v179_v18  ;;  %507 = vmatpush.xpose.msrb.mxu1 %v180_v19  ;;  %v249_v59 = vsel %vm172_vm2, %v241_v50, %v245_v51  ;;  %v323_v9 = vrot.slane %v854_v5, 3  ;;  %v396_v12 = vrot.slane %v846_v60, 6  ;;  %v400_v13 = vrot.slane %v852_v4, 5 }
  0xa0   :  { %v397_v14 = vrot.slane %v848_v61, 6  ;;  %v401_v15 = vrot.slane %v854_v5, 5  ;;  %v326_v16 = vsel %vm172_vm2, %v318_v6, %v322_v7 }
  0xa1   :  { %527 = vmatpush.xpose.msrb.mxu2 %v255_v24  ;;  %547 = vmatpush.xpose.msrb.mxu3 %v256_v25  ;;  %v327_v17 = vsel %vm172_vm2, %v319_v8, %v323_v9  ;;  %v404_v18 = vsel %vm172_vm2, %v396_v12, %v400_v13 }
  0xa2   :  { %372 = vmatmul.f32.vlgmr.msra.gmra.mxu0 %v345_v32  ;;  %392 = vmatmul.f32.vlgmr.msra.gmra.mxu1 %v346_v33  ;;  %v405_v19 = vsel %vm172_vm2, %v397_v14, %v401_v15 }
  0xa3   :  { %488 = vmatpush.xpose.msrb.mxu0 %v177_v30  ;;  %508 = vmatpush.xpose.msrb.mxu1 %v178_v31 }
  0xa4   :  { %450 = vmatmul.f32.vlgmr.msra.gmra.mxu2 %v423_v36  ;;  %470 = vmatmul.f32.vlgmr.msra.gmra.mxu3 %v424_v37 }
  0xa5   :  { %528 = vmatpush.xpose.msrb.mxu2 %v253_v34  ;;  %548 = vmatpush.xpose.msrb.mxu3 %v254_v35 }
  0xa7   :  { %489 = vmatpush.xpose.msrb.mxu0 %v175_v38  ;;  %509 = vmatpush.xpose.msrb.mxu1 %v176_v39 }
  0xa9   :  { %529 = vmatpush.xpose.msrb.mxu2 %v251_v42  ;;  %549 = vmatpush.xpose.msrb.mxu3 %v252_v43 }
  0xaa   :  { %490 = vmatmul.f32.vlgmr.msrb.gmra.mxu0 %v173_v54  ;;  %510 = vmatmul.f32.vlgmr.msrb.gmra.mxu1 %v174_v55 }
  0xab   :  { %566 = vmatpush.xpose.msra.mxu0 %v335_v40  ;;  %586 = vmatpush.xpose.msra.mxu1 %v336_v41 }
  0xac   :  { %530 = vmatmul.f32.vlgmr.msrb.gmra.mxu2 %v248_v58  ;;  %550 = vmatmul.f32.vlgmr.msrb.gmra.mxu3 %v249_v59 }
  0xad   :  { %606 = vmatpush.xpose.msra.mxu2 %v413_v46  ;;  %626 = vmatpush.xpose.msra.mxu3 %v414_v47  ;;  %v685_v46 = vld [vmem:[%s912_s4] ss:$0 sm:$0xff] }
  0xaf   :  { %567 = vmatpush.xpose.msra.mxu0 %v333_v52  ;;  %587 = vmatpush.xpose.msra.mxu1 %v334_v53 }
  0xb1   :  { %607 = vmatpush.xpose.msra.mxu2 %v411_v56  ;;  %627 = vmatpush.xpose.msra.mxu3 %v412_v57 }
  0xb3   :  { %568 = vmatpush.xpose.msra.mxu0 %v331_v62  ;;  %588 = vmatpush.xpose.msra.mxu1 %v332_v63 }
  0xb5   :  { %608 = vmatpush.xpose.msra.mxu2 %v409_v0  ;;  %628 = vmatpush.xpose.msra.mxu3 %v410_v1 }
  0xb7   :  { %569 = vmatpush.xpose.msra.mxu0 %v329_v2  ;;  %589 = vmatpush.xpose.msra.mxu1 %v330_v3 }
  0xb9   :  { %609 = vmatpush.xpose.msra.mxu2 %v407_v10  ;;  %629 = vmatpush.xpose.msra.mxu3 %v408_v11 }
  0xba   :  { %570 = vmatmul.f32.vlgmr.msra.gmra.mxu0 %v326_v16  ;;  %590 = vmatmul.f32.vlgmr.msra.gmra.mxu1 %v327_v17 }
  0xbc   :  { %610 = vmatmul.f32.vlgmr.msra.gmra.mxu2 %v404_v18  ;;  %630 = vmatmul.f32.vlgmr.msra.gmra.mxu3 %v405_v19 }
 0x117   :  { %v217_v60 = vpop.f32.mrf.mxu0  ;;  %v237_v20 = vpop.f32.mrf.mxu1 }
 0x118   :  { %v238_v30 = vadd.f32 %v237_v20, %v217_v60 }
 0x11f   :  { %v295_v4 = vpop.f32.mrf.mxu2  ;;  %v315_v61 = vpop.f32.mrf.mxu3 }
 0x120   :  { %v373_v21 = vpop.f32.mrf.mxu0  ;;  %v393_v22 = vpop.f32.mrf.mxu1  ;;  %v316_v28 = vadd.f32 %v315_v61, %v295_v4 }
 0x121   :  { %v394_v31 = vadd.f32 %v393_v22, %v373_v21 }
 0x127   :  { %v451_v5 = vpop.f32.mrf.mxu2  ;;  %v471_v23 = vpop.f32.mrf.mxu3 }
 0x128   :  { %v491_v24 = vpop.f32.mrf.mxu0  ;;  %v511_v26 = vpop.f32.mrf.mxu1  ;;  %v472_v33 = vadd.f32 %v471_v23, %v451_v5 }
 0x129   :  { %v492_v34 = vadd.f32 %v491_v24, %v238_v30 }
 0x12b   :  { %v512_v41 = vadd.f32 %v511_v26, %v492_v34 }
 0x12f   :  { %v531_v25 = vpop.f32.mrf.mxu2  ;;  %v551_v27 = vpop.f32.mrf.mxu3 }
 0x130   :  { %v532_v32 = vadd.f32 %v531_v25, %v316_v28 }
 0x132   :  { %v552_v37 = vadd.f32 %v551_v27, %v532_v32 }
 0x134   :  { %v634_v44 = vadd.f32 %v552_v37, %v512_v41 }
 0x137   :  { %v571_v29 = vpop.f32.mrf.mxu0  ;;  %v591_v39 = vpop.f32.mrf.mxu1 }
 0x138   :  { %v572_v35 = vadd.f32 %v571_v29, %v394_v31 }
 0x13a   :  { %v592_v42 = vadd.f32 %v591_v39, %v572_v35 }
 0x13f   :  { %v611_v36 = vpop.f32.mrf.mxu2  ;;  %v631_v40 = vpop.f32.mrf.mxu3 }
 0x140   :  { %v612_v38 = vadd.f32 %v611_v36, %v472_v33 }
 0x142   :  { %v632_v43 = vadd.f32 %v631_v40, %v612_v38 }
 0x144   :  { %v635_v45 = vadd.f32 %v632_v43, %v592_v42 }
 0x146   :  { %v636_v47 = vadd.f32 %v635_v45, %v634_v44 }
 0x148   :  { %v641_v48 = vadd.f32 %v685_v46, %v636_v47 }
 0x14a   :  { %643 = vst.msk [vmem:[#allocation5] sm:$0x3] %vm642_vm3, %v641_v48 }
 0x14b   :  { %654 = dma.vmem_to_hbm [thread:$0]  %s650_s17, 32, %s652_s20, [#allocation4]  }
 0x14c   :  { %736 = dma.done.wait [#allocation4], 32  }
 0x14d   :  { %737 = vsyncadd [#allocation4], 4294967264 }
 0x14e   :  { %659 = vsyncpa [#allocation3], 1 }
 0x14f   :  { %660 = vsyncpa [#allocation4], 1 }

</bundles_post_ra>
